<compile_context>
chip_gen: v7x
topology: tpu7x:2x2x1
jax: 0.10.0
libtpu: 0.0.40
codegen_flags: <defaults>
</compile_context>

<pallas_src>
import jax
import jax.numpy as jnp
from jax.experimental import pallas as pl
from jax.experimental.pallas import tpu as pltpu


def _round_up(x, m):
    return (x + m - 1) // m * m


def _embedding_kernel(lab_ref, noi_ref, wl_ref, wn_ref, b_ref, o_ref):
    # Two small-K MXU matmuls + one VPU bias add per tile; output tile is lane-dense.
    acc = jnp.dot(lab_ref[...], wl_ref[...], preferred_element_type=jnp.float32)
    acc = acc + jnp.dot(noi_ref[...], wn_ref[...], preferred_element_type=jnp.float32)
    o_ref[...] = (acc + b_ref[...]).astype(o_ref.dtype)


def fuse_params(params):
    """One-time parameter fusion (hoisted out of the forward path).

    Folds the positional Linear into rows 0..2 of the label weight, pre-sums the three biases,
    and builds the block-diagonal lane-fold weights when the embed dim is lane-narrow.
    """
    L, E = params["w_label"].shape
    N = params["w_noise"].shape[0]
    assert L >= 3, "PositionalEmbedding consumes label[..., :3]; label_size must be >= 3"

    # Lane-dense fold factor: pack F rows into the lane dim when E is lane-narrow.
    F = 128 // E if (E < 128 and 128 % E == 0) else 1

    w_label_eff = params["w_label"].at[:3, :].add(params["w_pos"])       # [L, E]
    w_noise = params["w_noise"]                                          # [N, E]
    bias = params["b_label"] + params["b_pos"] + params["b_noise"]       # [1, E]

    if F > 1:
        wl_f = jax.scipy.linalg.block_diag(*([w_label_eff] * F))         # [F*L, F*E]
        wn_f = jax.scipy.linalg.block_diag(*([w_noise] * F))             # [F*N, F*E]
        b_f = jnp.tile(bias, (1, F))                                     # [1, F*E]
    else:
        wl_f, wn_f, b_f = w_label_eff, w_noise, bias

    return dict(w_label=wl_f, w_noise=wn_f, bias=b_f, F=F, L=L, N=N, E=E)


def embedding_forward(label, noise, fused, *, tm_max=32768, out_dtype=jnp.float32):
    """label: [B, S, L] f32, noise: [B, S, N] f32 -> [B, S, E] (out_dtype).

    `fused` is the output of fuse_params(params) (computed once, not per call).
    """
    B, S, L = label.shape
    N = noise.shape[-1]
    F, E = fused["F"], fused["E"]
    assert L == fused["L"] and N == fused["N"]

    M = B * S
    unit = 8 * F                                  # folded sublane alignment (original rows)

    # Pad rows only to a multiple of `unit` (<= unit-1 rows), never to a full tile.
    M_pad = _round_up(M, unit)
    lab2 = label.reshape(M, L)
    noi2 = noise.reshape(M, N)
    if M_pad != M:
        lab2 = jnp.pad(lab2, ((0, M_pad - M), (0, 0)))
        noi2 = jnp.pad(noi2, ((0, M_pad - M), (0, 0)))

    # Lane fold: row-major reshapes (free views), F original rows per folded row.
    M_f = M_pad // F
    lab_f = lab2.reshape(M_f, F * L)
    noi_f = noi2.reshape(M_f, F * N)
    Ef = F * E

    # Tile selection (folded rows). tm_max original rows -> tmf_cap folded rows.
    # VMEM budget (double-buffered, 128-lane padding): ~3 * 2 * tmf * 128 * 4 B;
    # tmf=8192 (tm=32768 @ F=4) ~= 24 MiB, safely under the 48 MiB limit requested below.
    tmf_cap = max(8, (tm_max // F) // 8 * 8)
    grid = max(1, pl.cdiv(M_f, tmf_cap))
    if grid == 1 and M_f >= 16:
        grid = 2                                  # let v7x shard the row axis across its 2 TCs
    tmf = _round_up(pl.cdiv(M_f, grid), 8)        # balanced tiles; tail handled by Pallas masking
    grid = pl.cdiv(M_f, tmf)

    itemsize_out = jnp.dtype(out_dtype).itemsize
    cost = pl.CostEstimate(
        flops=2 * M_f * (F * L + F * N) * Ef,
        transcendentals=0,
        bytes_accessed=4 * (M_pad * (L + N) + F * (L + N) * Ef + Ef) + M_pad * E * itemsize_out,
    )

    out_f = pl.pallas_call(
        _embedding_kernel,
        out_shape=jax.ShapeDtypeStruct((M_f, Ef), out_dtype),
        grid_spec=pltpu.PrefetchScalarGridSpec(
            num_scalar_prefetch=0,
            grid=(grid,),
            in_specs=[
                pl.BlockSpec((tmf, F * L), lambda i: (i, 0)),   # label rows (folded)
                pl.BlockSpec((tmf, F * N), lambda i: (i, 0)),   # noise rows (folded)
                pl.BlockSpec((F * L, Ef), lambda i: (0, 0)),    # block-diag fused label(+pos) weight
                pl.BlockSpec((F * N, Ef), lambda i: (0, 0)),    # block-diag fused noise weight
                pl.BlockSpec((1, Ef), lambda i: (0, 0)),        # pre-summed bias
            ],
            out_specs=pl.BlockSpec((tmf, Ef), lambda i: (i, 0)),
        ),
        compiler_params=pltpu.CompilerParams(
            dimension_semantics=("parallel",),
            vmem_limit_bytes=48 * 1024 * 1024,
        ),
        cost_estimate=cost,
    )(lab_f, noi_f, fused["w_label"], fused["w_noise"], fused["bias"])

    out = out_f.reshape(M_pad, E)[:M]             # bitwise row-major un-fold + drop pad rows
    return out.reshape(B, S, E)


def init_params(key, label_size, noise_size, embed_size):
    ks = jax.random.split(key, 6)

    def lin(kw, kb, fan_in, fan_out):
        bound = 1.0 / jnp.sqrt(fan_in)
        wgt = jax.random.uniform(kw, (fan_in, fan_out), jnp.float32, -bound, bound)
        bia = jax.random.uniform(kb, (1, fan_out), jnp.float32, -bound, bound)
        return wgt, bia

    w_label, b_label = lin(ks[0], ks[1], label_size, embed_size)
    w_pos, b_pos = lin(ks[2], ks[3], 3, embed_size)
    w_noise, b_noise = lin(ks[4], ks[5], noise_size, embed_size)
    return dict(w_label=w_label, b_label=b_label,
                w_pos=w_pos, b_pos=b_pos,
                w_noise=w_noise, b_noise=b_noise)


if __name__ == "__main__":
    B, S = 2, 8
    label_size, noise_size, embed_size = 4, 6, 32

    key = jax.random.PRNGKey(0)
    k_label, k_noise, k_params = jax.random.split(key, 3)

    label = jax.random.normal(k_label, (B, S, label_size), jnp.float32)
    noise = jax.random.normal(k_noise, (B, S, noise_size), jnp.float32)
    params = init_params(k_params, label_size, noise_size, embed_size)

    fused = fuse_params(params)                   # one-time parameter fusion
    fused = jax.tree_util.tree_map(
        lambda x: jax.block_until_ready(x) if isinstance(x, jax.Array) else x, fused)

    out = embedding_forward(label, noise, fused)
    jax.block_until_ready(out)

    # Reference check in plain JAX (eval-mode dropout == identity), against the ORIGINAL params.
    label2d = label.reshape(-1, label_size)
    noise2d = noise.reshape(-1, noise_size)
    ref = (label2d @ params["w_label"] + params["b_label"]
           + label2d[:, :3] @ params["w_pos"] + params["b_pos"]
           + noise2d @ params["w_noise"] + params["b_noise"]).reshape(B, S, embed_size)

    assert out.shape == (B, S, embed_size)
    assert jnp.allclose(out, ref, atol=1e-4, rtol=1e-4)

    print("KERNEL_OK")
</pallas_src>

<mosaic_0001>
module attributes {stable_mosaic.version = 11 : i64} {
  func.func @_embedding_kernel(%arg0: i32, %arg1: memref<8x16xf32, #tpu.memory_space<vmem>>, %arg2: memref<8x24xf32, #tpu.memory_space<vmem>>, %arg3: memref<16x128xf32, #tpu.memory_space<vmem>>, %arg4: memref<24x128xf32, #tpu.memory_space<vmem>>, %arg5: memref<1x128xf32, #tpu.memory_space<vmem>>, %arg6: memref<8x128xf32, #tpu.memory_space<vmem>>) attributes {dimension_semantics = [#tpu.dimension_semantics<parallel>], iteration_bounds = array<i64: 1>, scalar_prefetch = 0 : i64, scratch_operands = 0 : i64, tpu.core_type = #tpu.core_type<tc>, window_params = [{transform_indices = @transform_0, window_bounds = array<i64: 8, 16>}, {transform_indices = @transform_1, window_bounds = array<i64: 8, 24>}, {pipeline_mode = #tpu.pipeline_mode<synchronous>, transform_indices = @transform_2, window_bounds = array<i64: 16, 128>}, {pipeline_mode = #tpu.pipeline_mode<synchronous>, transform_indices = @transform_3, window_bounds = array<i64: 24, 128>}, {pipeline_mode = #tpu.pipeline_mode<synchronous>, transform_indices = @transform_4, window_bounds = array<i64: 1, 128>}, {transform_indices = @transform_5, window_bounds = array<i64: 8, 128>}]} {
    %c0 = arith.constant 0 : index
    %c0_0 = arith.constant 0 : index
    %0 = vector.load %arg1[%c0, %c0_0] : memref<8x16xf32, #tpu.memory_space<vmem>>, vector<8x16xf32>
    %c0_1 = arith.constant 0 : index
    %c0_2 = arith.constant 0 : index
    %1 = vector.load %arg3[%c0_1, %c0_2] : memref<16x128xf32, #tpu.memory_space<vmem>>, vector<16x128xf32>
    %cst = arith.constant dense<0.000000e+00> : vector<8x128xf32>
    %2 = tpu.matmul %0, %1, %cst {dimension_numbers = #tpu.dot_dimension_numbers<[1], [0], [0], [1], [0, 0, 1, 1], [], []>} : vector<8x16xf32>, vector<16x128xf32>, vector<8x128xf32> -> vector<8x128xf32>
    %c0_3 = arith.constant 0 : index
    %c0_4 = arith.constant 0 : index
    %3 = vector.load %arg2[%c0_3, %c0_4] : memref<8x24xf32, #tpu.memory_space<vmem>>, vector<8x24xf32>
    %c0_5 = arith.constant 0 : index
    %c0_6 = arith.constant 0 : index
    %4 = vector.load %arg4[%c0_5, %c0_6] : memref<24x128xf32, #tpu.memory_space<vmem>>, vector<24x128xf32>
    %cst_7 = arith.constant dense<0.000000e+00> : vector<8x128xf32>
    %5 = tpu.matmul %3, %4, %cst_7 {dimension_numbers = #tpu.dot_dimension_numbers<[1], [0], [0], [1], [0, 0, 1, 1], [], []>} : vector<8x24xf32>, vector<24x128xf32>, vector<8x128xf32> -> vector<8x128xf32>
    %6 = arith.addf %2, %5 : vector<8x128xf32>
    %c0_8 = arith.constant 0 : index
    %c0_9 = arith.constant 0 : index
    %7 = vector.load %arg5[%c0_8, %c0_9] : memref<1x128xf32, #tpu.memory_space<vmem>>, vector<1x128xf32>
    %8 = vector.broadcast %7 : vector<1x128xf32> to vector<8x128xf32>
    %9 = arith.addf %6, %8 : vector<8x128xf32>
    %c0_10 = arith.constant 0 : index
    %c0_11 = arith.constant 0 : index
    %10 = vector.load %arg6[%c0_10, %c0_11] : memref<8x128xf32, #tpu.memory_space<vmem>>, vector<8x128xf32>
    tpu.vector_store %arg6[%c0_10, %c0_11], %9 {strides = array<i32>} : memref<8x128xf32, #tpu.memory_space<vmem>>, vector<8x128xf32>,
    return
  }
  func.func @transform_0(%arg0: i32) -> (i32, i32) {
    %c0_i32 = arith.constant 0 : i32
    %c0_i32_0 = arith.constant 0 : i32
    return %arg0, %c0_i32 : i32, i32
  }
  func.func @transform_1(%arg0: i32) -> (i32, i32) {
    %c0_i32 = arith.constant 0 : i32
    %c0_i32_0 = arith.constant 0 : i32
    return %arg0, %c0_i32 : i32, i32
  }
  func.func @transform_2(%arg0: i32) -> (i32, i32) {
    %c0_i32 = arith.constant 0 : i32
    %c0_i32_0 = arith.constant 0 : i32
    %c0_i32_1 = arith.constant 0 : i32
    return %c0_i32, %c0_i32_0 : i32, i32
  }
  func.func @transform_3(%arg0: i32) -> (i32, i32) {
    %c0_i32 = arith.constant 0 : i32
    %c0_i32_0 = arith.constant 0 : i32
    %c0_i32_1 = arith.constant 0 : i32
    return %c0_i32, %c0_i32_0 : i32, i32
  }
  func.func @transform_4(%arg0: i32) -> (i32, i32) {
    %c0_i32 = arith.constant 0 : i32
    %c0_i32_0 = arith.constant 0 : i32
    %c0_i32_1 = arith.constant 0 : i32
    return %c0_i32, %c0_i32_0 : i32, i32
  }
  func.func @transform_5(%arg0: i32) -> (i32, i32) {
    %c0_i32 = arith.constant 0 : i32
    %c0_i32_0 = arith.constant 0 : i32
    return %arg0, %c0_i32 : i32, i32
  }
}

</mosaic_0001>

<bundles_post_ra>
// kernel: tpu_custom_call.1
= control target key start
LH: loop header
LB: loop body
LE: loop exit
PB: predicated region body
PF: predicated region fallthrough
CT: control target
= control target key end

     0   :  { %10 = vsyncpa [#allocation3], 0  ;;  %s516_s0 = inlined_call_operand.hbm [shape: f32[8,16], index: 0, kind: input, shape index: {}]   ;;  %s517_s1 = inlined_call_operand.hbm [shape: f32[8,24], index: 1, kind: input, shape index: {}]   ;;  %s518_s2 = inlined_call_operand.hbm [shape: f32[16,128], index: 2, kind: input, shape index: {}]   ;;  %s519_s3 = inlined_call_operand.hbm [shape: f32[24,128], index: 3, kind: input, shape index: {}]   ;;  %s520_s4 = inlined_call_operand.vmem [shape: f32[1,128], index: 4, kind: input, shape index: {}]   ;;  %s521_s5 = inlined_call_operand.hbm [shape: f32[8,128], index: 5, kind: output, shape index: {}]  }
   0x1   :  { %11 = vsyncpa [#allocation6], 0 }
   0x2   :  { %12 = vsyncpa [#allocation9], 0 }
   0x3   :  { %13 = vsyncpa [#allocation4], 0  ;;  %s413_s18 = smov [#allocation5]   ;;  %s414_s20 = smov [#allocation2]  }
   0x4   :  { %s30_s19 = sshll.u32 %s413_s18, 4  ;;  %s20_s21 = sshll.u32 %s414_s20, 4  ;;  %s31_s19 = int_to_ptr.vmem [resolvable:$true] %s30_s19  ;;  %s21_s21 = int_to_ptr.vmem [resolvable:$true] %s20_s21 }
   0x5   :  { %s295_s24 = scalar_lea.hbm %s517_s1, 128 }
   0x6   :  { %p296_p0 = scmp.ne.s32.totalorder %s517_s1, %s295_s24  ;;  %p299_p1 = scmp.lt.u32.totalorder %s295_s24, %s517_s1 }
   0x8   :  { %p301_p2 = pnand %p299_p1, %p296_p0 }
   0xa   :  { %304 = shalt.err (!%p301_p2)
}
   0xb   :  { %s305_s29 = scalar_lea.vmem %s31_s19, 128  ;;  %p310_p4 = scmp.lt.s32.totalorder %s31_s19, %s31_s19 }
   0xc   :  { %p306_p3 = scmp.ne.s32.totalorder %s31_s19, %s305_s29  ;;  %p311_p5 = scmp.lt.s32.totalorder %s305_s29, %s305_s29 }
   0xe   :  { %p312_p6 = por %p311_p5, %p310_p4 }
  0x10   :  { %p313_p7 = pnand %p312_p6, %p306_p3 }
  0x12   :  { %316 = shalt.err (!%p313_p7)
}
  0x13   :  { %33 = dma.hbm_to_vmem [thread:$0]  %s517_s1, 128, %s31_s19, [#allocation6]  }
  0x14   :  { %s317_s9 = scalar_lea.hbm %s516_s0, 128 }
  0x15   :  { %p318_p8 = scmp.ne.s32.totalorder %s516_s0, %s317_s9  ;;  %p321_p9 = scmp.lt.u32.totalorder %s317_s9, %s516_s0 }
  0x17   :  { %p323_p10 = pnand %p321_p9, %p318_p8 }
  0x19   :  { %326 = shalt.err (!%p323_p10)
}
  0x1a   :  { %s327_s14 = scalar_lea.vmem %s21_s21, 128  ;;  %p332_p12 = scmp.lt.s32.totalorder %s21_s21, %s21_s21 }
  0x1b   :  { %p328_p11 = scmp.ne.s32.totalorder %s21_s21, %s327_s14  ;;  %p333_p13 = scmp.lt.s32.totalorder %s327_s14, %s327_s14 }
  0x1d   :  { %p334_p0 = por %p333_p13, %p332_p12 }
  0x1f   :  { %p335_p1 = pnand %p334_p0, %p328_p11 }
  0x21   :  { %338 = shalt.err (!%p335_p1)
}
  0x22   :  { %23 = dma.hbm_to_vmem [thread:$0]  %s516_s0, 128, %s21_s21, [#allocation3]  }
  0x23   :  { %s415_s16 = smov [#allocation7]   ;;  %s339_s20 = scalar_lea.hbm %s518_s2, 256 }
  0x24   :  { %s39_s17 = sshll.u32 %s415_s16, 4  ;;  %p340_p2 = scmp.ne.s32.totalorder %s518_s2, %s339_s20  ;;  %s40_s17 = int_to_ptr.vmem [resolvable:$true] %s39_s17 }
  0x25   :  { %p343_p3 = scmp.lt.u32.totalorder %s339_s20, %s518_s2 }
  0x27   :  { %p345_p4 = pnand %p343_p3, %p340_p2 }
  0x29   :  { %348 = shalt.err (!%p345_p4)
}
  0x2a   :  { %s349_s26 = scalar_lea.vmem %s40_s17, 256  ;;  %p354_p6 = scmp.lt.s32.totalorder %s40_s17, %s40_s17 }
  0x2b   :  { %p350_p5 = scmp.ne.s32.totalorder %s40_s17, %s349_s26  ;;  %p355_p7 = scmp.lt.s32.totalorder %s349_s26, %s349_s26 }
  0x2d   :  { %p356_p8 = por %p355_p7, %p354_p6 }
  0x2f   :  { %p357_p9 = pnand %p356_p8, %p350_p5 }
  0x31   :  { %360 = shalt.err (!%p357_p9)
}
  0x32   :  { %s416_s0 = smov 128   ;;  %s417_s21 = smov 8  }
  0x33   :  { %45 = dma.hbm_to_vmem [thread:$0]  %s518_s2, 256, %s40_s17, [#allocation6], %s416_s0, %s416_s0, %s417_s21  }
  0x34   :  { %s418_s29 = smov [#allocation8]   ;;  %s361_s8 = scalar_lea.hbm %s519_s3, 384 }
  0x35   :  { %s51_s30 = sshll.u32 %s418_s29, 4  ;;  %p362_p10 = scmp.ne.s32.totalorder %s519_s3, %s361_s8  ;;  %s52_s30 = int_to_ptr.vmem [resolvable:$true] %s51_s30 }
  0x36   :  { %p365_p11 = scmp.lt.u32.totalorder %s361_s8, %s519_s3 }
  0x38   :  { %p367_p12 = pnand %p365_p11, %p362_p10 }
  0x3a   :  { %370 = shalt.err (!%p367_p12)
}
  0x3b   :  { %s371_s13 = scalar_lea.vmem %s52_s30, 384  ;;  %p376_p0 = scmp.lt.s32.totalorder %s52_s30, %s52_s30 }
  0x3c   :  { %p372_p13 = scmp.ne.s32.totalorder %s52_s30, %s371_s13  ;;  %p377_p1 = scmp.lt.s32.totalorder %s371_s13, %s371_s13 }
  0x3e   :  { %p378_p2 = por %p377_p1, %p376_p0 }
  0x40   :  { %p379_p3 = pnand %p378_p2, %p372_p13 }
  0x42   :  { %382 = shalt.err (!%p379_p3)
}
  0x43   :  { %57 = dma.hbm_to_vmem [thread:$0]  %s519_s3, 384, %s52_s30, [#allocation9], %s416_s0, %s416_s0, %s417_s21  }
  0x44   :  { %405 = dma.done.wait [#allocation3], 128  }
  0x45   :  { %406 = vsyncadd [#allocation3], 4294967168 }
  0x46   :  { %407 = dma.done.wait [#allocation6], 384  }
  0x47   :  { %408 = vsyncadd [#allocation6], 4294966912 }
  0x48   :  { %409 = dma.done.wait [#allocation9], 384  }
  0x49   :  { %410 = vsyncadd [#allocation9], 4294966912  ;;  %v419_v0 = vmov 0.0|0.0   ;;  %vm420_vm0 = vmmov 0   ;;  %v421_v1 = vmov 0.0   ;;  %v76_v2 = vld [vmem:[#allocation8] sm:$0xff] }
  0x4a   :  { %279 = vmatprep.subr.bf16.mxu0 %v419_v0  ;;  %282 = vmatprep.subr.bf16.mxu1 %v419_v0  ;;  %v77_v3 = vld [vmem:[#allocation8 + $0x8] sm:$0xff]  ;;  %v73_v4 = vld [vmem:[#allocation7] sm:$0xff]  ;;  %v74_v6 = vld [vmem:[#allocation7 + $0x8] sm:$0xff]  ;;  %vm153_vm1 = vcmask 130048   ;;  %vm79_vm2 = vcmask 195584   ;;  %s422_s15 = smov [#allocation10]  }
  0x4b   :  { %276 = vmatprep.mubr.msk.f32.mxu1 %vm420_vm0, %v421_v1  ;;  %269 = vmatprep.mubr.msk.f32.mxu0 %vm420_vm0, %v421_v1  ;;  %v280_v5 = vpack.c.bf16 %v77_v3, %v76_v2  ;;  %v283_v7 = vpack.c.bf16 %v74_v6, %v73_v4  ;;  %v78_v8 = vld [vmem:[#allocation8 + $0x10] sm:$0xff]  ;;  %v72_v9 = vld [vmem:[#allocation2] sm:$0xff]  ;;  %v75_v10 = vld [vmem:[#allocation5] sm:$0xff]  ;;  %s242_s16 = sshll.u32 %s422_s15, 4  ;;  %s243_s16 = int_to_ptr.vmem [resolvable:$true] %s242_s16 }
  0x4c   :  { %v255_v13 = vld [vmem:[%s520_s4] ss:$0 sm:$0xff]  ;;  %s383_s17 = scalar_lea.vmem %s243_s16, 128  ;;  %p388_p5 = scmp.lt.s32.totalorder %s243_s16, %s243_s16 }
  0x4d   :  { %281 = vmatpush3.bf16.msra.mxu0 %v280_v5  ;;  %284 = vmatpush3.bf16.msra.mxu1 %v283_v7  ;;  %p384_p4 = scmp.ne.s32.totalorder %s243_s16, %s383_s17  ;;  %p389_p6 = scmp.lt.s32.totalorder %s383_s17, %s383_s17 }
  0x4e   :  { %267 = vmatprep.subr.mxu0 %v421_v1 }
  0x4f   :  { %p390_p7 = por %p389_p6, %p388_p5 }
  0x50   :  { %277 = vmatmul.mubr.msk.f32.vlgmr.msra.gmra.mrb[0].mxu1 %vm153_vm1, %v72_v9 }
  0x51   :  { %268 = vmatpush3.msra.mxu0 %v78_v8  ;;  %p391_p8 = pnand %p390_p7, %p384_p4 }
  0x52   :  { %270 = vmatmul.mubr.msk.f32.vlgmr.msra.gmra.mrb[0].mxu0 %vm79_vm2, %v75_v10 }
 0x123   :  { %v223_v11 = vpop.f32.mrb[0].mxu1 }
 0x124   :  { %v278_v14 = vpop.f32.mrb[1].mxu1 }
 0x125   :  { %v149_v12 = vpop.f32.mrb[0].mxu0 }
 0x126   :  { %v224_v15 = vadd.f32 %v223_v11, %v149_v12  ;;  %v271_v16 = vpop.f32.mrb[1].mxu0 }
 0x128   :  { %v234_v17 = vadd.f32 %v255_v13, %v224_v15 }
 0x12a   :  { %235 = vst [vmem:[#allocation10] sm:$0xff] %v234_v17 }
 0x12b   :  { %394 = shalt.err (!%p391_p8)
}
 0x12c   :  { %s395_s20 = scalar_lea.hbm %s521_s5, 128 }
 0x12d   :  { %p396_p9 = scmp.ne.s32.totalorder %s521_s5, %s395_s20  ;;  %p399_p10 = scmp.lt.u32.totalorder %s395_s20, %s521_s5 }
 0x12f   :  { %p401_p11 = pnand %p399_p10, %p396_p9 }
 0x131   :  { %404 = shalt.err (!%p401_p11)
}
 0x132   :  { %245 = dma.vmem_to_hbm [thread:$0]  %s243_s16, 128, %s521_s5, [#allocation4]  }
 0x133   :  { %411 = dma.done.wait [#allocation4], 128  }
 0x134   :  { %412 = vsyncadd [#allocation4], 4294967168 }
 0x135   :  { %249 = vsyncpa [#allocation3], 1 }
 0x136   :  { %250 = vsyncpa [#allocation6], 1 }
 0x137   :  { %251 = vsyncpa [#allocation9], 1 }
 0x138   :  { %252 = vsyncpa [#allocation4], 1 }

</bundles_post_ra>
